<compile_context>
chip_gen: v5e
topology: v5e:2x2
jax: 0.10.0
libtpu: 0.0.40
codegen_flags: <defaults>
</compile_context>

<pallas_src>
import math

import jax
import jax.numpy as jnp
from jax.experimental import pallas as pl
from jax.experimental.pallas import tpu as pltpu


def gcn_kernel(text_ref, adj_ref, mask_ref,
               w1_ref, b1_ref, w2_ref, b2_ref,
               out_ref):
    bblk, n, d_in = text_ref.shape
    dp = w1_ref.shape[1]          # lane-dense intermediate width
    d_out = out_ref.shape[2]      # true module feature width D

    text = text_ref[...]                      # (bblk, n, d_in)  bf16
    adj_f32 = adj_ref[...]                    # (bblk, n, n)     f32 (exact denom)
    adj = adj_f32.astype(jnp.bfloat16)        # bf16 operand for the MXU matmuls
    mask = mask_ref[...]                      # (bblk, n, 1)     f32
    w1 = w1_ref[...]                          # (d_in, dp)       bf16
    w2 = w2_ref[...]                          # (dp, dp)         bf16
    b1 = b1_ref[...]                          # (1, dp)          f32
    b2 = b2_ref[...]                          # (1, dp)          f32

    # Row-degree normalizer: exact f32, computed once and reused by both layers.
    inv_denom = 1.0 / (jnp.sum(adj_f32, axis=2, keepdims=True) + 1.0)

    def layer(x, w, b):
        # Fused feature matmul across the whole batch block:
        #   (bblk*n, K) @ (K, dp)  -- K is the true input width (no K padding).
        k = x.shape[-1]
        h = jnp.dot(x.reshape(bblk * n, k), w,
                    preferred_element_type=jnp.float32).reshape(bblk, n, dp)
        # Batched adjacency matmul, bf16 operands / f32 accumulation.
        # (If this ever dominates a profile, pack the block into a
        #  block-diagonal (bblk*n, bblk*n) adjacency wrapper-side and do one
        #  full-shape MXU matmul per layer instead of bblk tiny-K matmuls.)
        o = jnp.einsum('bnm,bmd->bnd', adj, h.astype(jnp.bfloat16),
                       preferred_element_type=jnp.float32)
        return jnp.maximum(o * inv_denom + b, 0.0)

    x1 = layer(text, w1, b1)
    x2 = layer(x1.astype(jnp.bfloat16), w2, b2)

    # Store only the real D feature columns (out_ref last dim == D): avoids 4x
    # HBM write amplification and the wrapper-side slice copy.
    out_ref[...] = x2[:, :, :d_out] * mask


def _pick_block_b(batch, n, target_rows=256):
    """Batch-block size.

    * Tiny batches (batch*n <= target_rows): a single grid step.  The grid is
      a serial loop on single-TC chips (v5e/v6e), so splitting tiny work only
      adds ~0.35us/step of pipeline overhead; on v7x the per-core fixed cost
      also beats the 2-TC win at this size.
    * Larger batches: largest divisor of `batch` with bblk*n <= target_rows so
      the fused feature matmul fills the 256-row MXU (v6e/v7x) per pass while
      leaving several "parallel" steps for v7x megacore sharding.
    """
    if batch * n <= target_rows:
        return batch
    best = 1
    for c in range(1, batch + 1):
        if batch % c == 0 and c * n <= target_rows:
            best = c
    return best


def gcn_forward(lstm_feature, sentence_adjs, mask, w1, b1, w2, b2, *, block_b=None):
    B, N, D = lstm_feature.shape

    # Lane-dense width for the intermediates / weight OUTPUT columns only.
    dp = pl.cdiv(D, 128) * 128
    pad_d = dp - D

    # Matmul operands in bf16 (halves DMA bytes and MXU passes); adjacency is
    # kept f32 so the row-degree denominator is computed exactly, and cast to
    # bf16 in-kernel only where it feeds the MXU.
    feat = lstm_feature.astype(jnp.bfloat16)
    adj = sentence_adjs.astype(jnp.float32)
    mask3 = mask.astype(jnp.float32).reshape(B, N, 1)

    def pad_cols(x, rows_pad=0):
        x = jnp.pad(x, ((0, rows_pad), (0, pad_d))) if (pad_d or rows_pad) else x
        return x

    # Layer 1 weight keeps its true K = D (no contraction-dim padding); only
    # output columns are zero-padded.  Layer 2's K must be dp (x1 is dp wide).
    w1p = pad_cols(w1.astype(jnp.bfloat16))                      # (D, dp)
    w2p = pad_cols(w2.astype(jnp.bfloat16), rows_pad=pad_d)      # (dp, dp)
    b1p = pad_cols(b1.astype(jnp.float32).reshape(1, D))         # (1, dp)
    b2p = pad_cols(b2.astype(jnp.float32).reshape(1, D))         # (1, dp)

    bblk = block_b if block_b is not None else _pick_block_b(B, N)
    assert B % bblk == 0
    grid = (B // bblk,)

    out = pl.pallas_call(
        gcn_kernel,
        out_shape=jax.ShapeDtypeStruct((B, N, D), jnp.float32),
        grid_spec=pltpu.PrefetchScalarGridSpec(
            num_scalar_prefetch=0,
            grid=grid,
            in_specs=[
                pl.BlockSpec((bblk, N, D), lambda i: (i, 0, 0)),   # features (bf16)
                pl.BlockSpec((bblk, N, N), lambda i: (i, 0, 0)),   # adjacency (f32)
                pl.BlockSpec((bblk, N, 1), lambda i: (i, 0, 0)),   # mask (f32)
                pl.BlockSpec((D, dp), lambda i: (0, 0)),           # W1 (bf16)
                pl.BlockSpec((1, dp), lambda i: (0, 0)),           # b1 (f32)
                pl.BlockSpec((dp, dp), lambda i: (0, 0)),          # W2 (bf16)
                pl.BlockSpec((1, dp), lambda i: (0, 0)),           # b2 (f32)
            ],
            out_specs=pl.BlockSpec((bblk, N, D), lambda i: (i, 0, 0)),
        ),
        compiler_params=pltpu.CompilerParams(
            dimension_semantics=("parallel",)),
    )(feat, adj, mask3, w1p, b1p, w2p, b2p)

    return out


def gcn_reference(lstm_feature, sentence_adjs, mask, w1, b1, w2, b2):
    """Plain-JAX f32 reference mirroring the PyTorch forward (exact divide)."""
    def gc(text, adj, w, b):
        hidden = jnp.matmul(text, w)
        denom = jnp.sum(adj, axis=2, keepdims=True) + 1.0
        return jnp.matmul(adj, hidden) / denom + b
    x = jax.nn.relu(gc(lstm_feature, sentence_adjs, w1, b1))
    x = jax.nn.relu(gc(x, sentence_adjs, w2, b2))
    return x * mask[:, :, None].astype(jnp.float32)


if __name__ == "__main__":
    # Small shapes implied by the module: batch=2, seq(N)=16, lstm_dim=16 -> D=32
    B, N, lstm_dim = 2, 16, 16
    D = 2 * lstm_dim

    key = jax.random.PRNGKey(0)
    k_feat, k_adj, k_mask, k_w1, k_b1, k_w2, k_b2 = jax.random.split(key, 7)

    lstm_feature = jax.random.normal(k_feat, (B, N, D), dtype=jnp.float32)
    adjs = (jax.random.uniform(k_adj, (B, N, N)) > 0.5).astype(jnp.float32)
    mask = (jax.random.uniform(k_mask, (B, N)) > 0.3).astype(jnp.float32)

    # Deterministic parameter init mimicking reset_parameters (uniform(-stdv, stdv))
    stdv = 1.0 / math.sqrt(D)
    w1 = jax.random.uniform(k_w1, (D, D), minval=-stdv, maxval=stdv, dtype=jnp.float32)
    b1 = jax.random.uniform(k_b1, (D,), minval=-stdv, maxval=stdv, dtype=jnp.float32)
    w2 = jax.random.uniform(k_w2, (D, D), minval=-stdv, maxval=stdv, dtype=jnp.float32)
    b2 = jax.random.uniform(k_b2, (D,), minval=-stdv, maxval=stdv, dtype=jnp.float32)
    # TODO(synk): gc3 is defined in GCNModel.__init__ but never used in forward; omitted.

    out = jax.block_until_ready(gcn_forward(lstm_feature, adjs, mask, w1, b1, w2, b2))
    ref = gcn_reference(lstm_feature, adjs, mask, w1, b1, w2, b2)

    assert out.shape == (B, N, D)
    # Normalization is an exact f32 divide now; the only relaxed numerics are
    # the bf16 matmul operands (f32 accumulation), which stay well inside 2e-2.
    max_err = float(jnp.max(jnp.abs(out - ref)))
    assert jnp.allclose(out, ref, atol=2e-2, rtol=2e-2), (
        f"mismatch vs reference: max abs diff {max_err}")
    print("KERNEL_OK")
</pallas_src>

<mosaic_0001>
module attributes {stable_mosaic.version = 11 : i64} {
  func.func @gcn_kernel(%arg0: i32, %arg1: memref<2x16x32xbf16, #tpu.memory_space<vmem>>, %arg2: memref<2x16x16xf32, #tpu.memory_space<vmem>>, %arg3: memref<2x16x1xf32, #tpu.memory_space<vmem>>, %arg4: memref<32x128xbf16, #tpu.memory_space<vmem>>, %arg5: memref<1x128xf32, #tpu.memory_space<vmem>>, %arg6: memref<128x128xbf16, #tpu.memory_space<vmem>>, %arg7: memref<1x128xf32, #tpu.memory_space<vmem>>, %arg8: memref<2x16x32xf32, #tpu.memory_space<vmem>>) attributes {dimension_semantics = [#tpu.dimension_semantics<parallel>], iteration_bounds = array<i64: 1>, scalar_prefetch = 0 : i64, scratch_operands = 0 : i64, tpu.core_type = #tpu.core_type<tc>, window_params = [{transform_indices = @transform_0, window_bounds = array<i64: 2, 16, 32>}, {transform_indices = @transform_1, window_bounds = array<i64: 2, 16, 16>}, {transform_indices = @transform_2, window_bounds = array<i64: 2, 16, 1>}, {pipeline_mode = #tpu.pipeline_mode<synchronous>, transform_indices = @transform_3, window_bounds = array<i64: 32, 128>}, {pipeline_mode = #tpu.pipeline_mode<synchronous>, transform_indices = @transform_4, window_bounds = array<i64: 1, 128>}, {pipeline_mode = #tpu.pipeline_mode<synchronous>, transform_indices = @transform_5, window_bounds = array<i64: 128, 128>}, {pipeline_mode = #tpu.pipeline_mode<synchronous>, transform_indices = @transform_6, window_bounds = array<i64: 1, 128>}, {transform_indices = @transform_7, window_bounds = array<i64: 2, 16, 32>}]} {
    %c0 = arith.constant 0 : index
    %c0_0 = arith.constant 0 : index
    %c0_1 = arith.constant 0 : index
    %0 = vector.load %arg1[%c0, %c0_0, %c0_1] : memref<2x16x32xbf16, #tpu.memory_space<vmem>>, vector<2x16x32xbf16>
    %c0_2 = arith.constant 0 : index
    %c0_3 = arith.constant 0 : index
    %c0_4 = arith.constant 0 : index
    %1 = vector.load %arg2[%c0_2, %c0_3, %c0_4] : memref<2x16x16xf32, #tpu.memory_space<vmem>>, vector<2x16x16xf32>
    %2 = arith.truncf %1 : vector<2x16x16xf32> to vector<2x16x16xbf16>
    %c0_5 = arith.constant 0 : index
    %c0_6 = arith.constant 0 : index
    %c0_7 = arith.constant 0 : index
    %3 = vector.load %arg3[%c0_5, %c0_6, %c0_7] : memref<2x16x1xf32, #tpu.memory_space<vmem>>, vector<2x16x1xf32>
    %c0_8 = arith.constant 0 : index
    %c0_9 = arith.constant 0 : index
    %4 = vector.load %arg4[%c0_8, %c0_9] : memref<32x128xbf16, #tpu.memory_space<vmem>>, vector<32x128xbf16>
    %c0_10 = arith.constant 0 : index
    %c0_11 = arith.constant 0 : index
    %5 = vector.load %arg6[%c0_10, %c0_11] : memref<128x128xbf16, #tpu.memory_space<vmem>>, vector<128x128xbf16>
    %c0_12 = arith.constant 0 : index
    %c0_13 = arith.constant 0 : index
    %6 = vector.load %arg5[%c0_12, %c0_13] : memref<1x128xf32, #tpu.memory_space<vmem>>, vector<1x128xf32>
    %c0_14 = arith.constant 0 : index
    %c0_15 = arith.constant 0 : index
    %7 = vector.load %arg7[%c0_14, %c0_15] : memref<1x128xf32, #tpu.memory_space<vmem>>, vector<1x128xf32>
    %cst = arith.constant dense<0.000000e+00> : vector<2x16xf32>
    %8 = vector.multi_reduction <add>, %1, %cst [2] : vector<2x16x16xf32> to vector<2x16xf32>
    %9 = vector.shape_cast %8 : vector<2x16xf32> to vector<2x16x1xf32>
    %cst_16 = arith.constant 1.000000e+00 : f32
    %10 = vector.broadcast %cst_16 : f32 to vector<2x16x1xf32>
    %11 = arith.addf %9, %10 : vector<2x16x1xf32>
    %cst_17 = arith.constant 1.000000e+00 : f32
    %12 = vector.broadcast %cst_17 : f32 to vector<2x16x1xf32>
    %13 = arith.divf %12, %11 : vector<2x16x1xf32>
    %14 = vector.shape_cast %0 : vector<2x16x32xbf16> to vector<32x32xbf16>
    %cst_18 = arith.constant dense<0.000000e+00> : vector<32x128xf32>
    %15 = tpu.matmul %14, %4, %cst_18 {dimension_numbers = #tpu.dot_dimension_numbers<[1], [0], [0], [1], [0, 0, 1, 1], [], []>} : vector<32x32xbf16>, vector<32x128xbf16>, vector<32x128xf32> -> vector<32x128xf32>
    %16 = vector.shape_cast %15 : vector<32x128xf32> to vector<2x16x128xf32>
    %17 = arith.truncf %16 : vector<2x16x128xf32> to vector<2x16x128xbf16>
    "tpu.trace_start"() <{level = 10 : i32, message = "bnm,bmd->bnd"}> : () -> ()
    %cst_19 = arith.constant dense<0.000000e+00> : vector<2x16x128xf32>
    %18 = tpu.matmul %2, %17, %cst_19 {dimension_numbers = #tpu.dot_dimension_numbers<[2], [1], [1], [2], [0, 0, 0, 1, 1, 2], [0], [0]>} : vector<2x16x16xbf16>, vector<2x16x128xbf16>, vector<2x16x128xf32> -> vector<2x16x128xf32>
    "tpu.trace_stop"() : () -> ()
    %19 = vector.broadcast %13 : vector<2x16x1xf32> to vector<2x16x128xf32>
    %20 = arith.mulf %18, %19 : vector<2x16x128xf32>
    %21 = vector.shape_cast %6 : vector<1x128xf32> to vector<1x1x128xf32>
    %22 = vector.broadcast %21 : vector<1x1x128xf32> to vector<2x16x128xf32>
    %23 = arith.addf %20, %22 : vector<2x16x128xf32>
    %cst_20 = arith.constant 0.000000e+00 : f32
    %24 = vector.broadcast %cst_20 : f32 to vector<2x16x128xf32>
    %25 = arith.maximumf %23, %24 : vector<2x16x128xf32>
    %26 = arith.truncf %25 : vector<2x16x128xf32> to vector<2x16x128xbf16>
    %27 = vector.shape_cast %26 : vector<2x16x128xbf16> to vector<32x128xbf16>
    %cst_21 = arith.constant dense<0.000000e+00> : vector<32x128xf32>
    %28 = tpu.matmul %27, %5, %cst_21 {dimension_numbers = #tpu.dot_dimension_numbers<[1], [0], [0], [1], [0, 0, 1, 1], [], []>} : vector<32x128xbf16>, vector<128x128xbf16>, vector<32x128xf32> -> vector<32x128xf32>
    %29 = vector.shape_cast %28 : vector<32x128xf32> to vector<2x16x128xf32>
    %30 = arith.truncf %29 : vector<2x16x128xf32> to vector<2x16x128xbf16>
    "tpu.trace_start"() <{level = 10 : i32, message = "bnm,bmd->bnd"}> : () -> ()
    %cst_22 = arith.constant dense<0.000000e+00> : vector<2x16x128xf32>
    %31 = tpu.matmul %2, %30, %cst_22 {dimension_numbers = #tpu.dot_dimension_numbers<[2], [1], [1], [2], [0, 0, 0, 1, 1, 2], [0], [0]>} : vector<2x16x16xbf16>, vector<2x16x128xbf16>, vector<2x16x128xf32> -> vector<2x16x128xf32>
    "tpu.trace_stop"() : () -> ()
    %32 = vector.broadcast %13 : vector<2x16x1xf32> to vector<2x16x128xf32>
    %33 = arith.mulf %31, %32 : vector<2x16x128xf32>
    %34 = vector.shape_cast %7 : vector<1x128xf32> to vector<1x1x128xf32>
    %35 = vector.broadcast %34 : vector<1x1x128xf32> to vector<2x16x128xf32>
    %36 = arith.addf %33, %35 : vector<2x16x128xf32>
    %cst_23 = arith.constant 0.000000e+00 : f32
    %37 = vector.broadcast %cst_23 : f32 to vector<2x16x128xf32>
    %38 = arith.maximumf %36, %37 : vector<2x16x128xf32>
    %39 = vector.extract_strided_slice %38 {offsets = [0, 0, 0], sizes = [2, 16, 32], strides = [1, 1, 1]} : vector<2x16x128xf32> to vector<2x16x32xf32>
    %40 = vector.broadcast %3 : vector<2x16x1xf32> to vector<2x16x32xf32>
    %41 = arith.mulf %39, %40 : vector<2x16x32xf32>
    %c0_24 = arith.constant 0 : index
    %c0_25 = arith.constant 0 : index
    %c0_26 = arith.constant 0 : index
    %42 = vector.load %arg8[%c0_24, %c0_25, %c0_26] : memref<2x16x32xf32, #tpu.memory_space<vmem>>, vector<2x16x32xf32>
    tpu.vector_store %arg8[%c0_24, %c0_25, %c0_26], %41 {strides = array<i32>} : memref<2x16x32xf32, #tpu.memory_space<vmem>>, vector<2x16x32xf32>,
    return
  }
  func.func @transform_0(%arg0: i32) -> (i32, i32, i32) {
    %c0_i32 = arith.constant 0 : i32
    %c0_i32_0 = arith.constant 0 : i32
    %c0_i32_1 = arith.constant 0 : i32
    return %arg0, %c0_i32, %c0_i32_0 : i32, i32, i32
  }
  func.func @transform_1(%arg0: i32) -> (i32, i32, i32) {
    %c0_i32 = arith.constant 0 : i32
    %c0_i32_0 = arith.constant 0 : i32
    %c0_i32_1 = arith.constant 0 : i32
    return %arg0, %c0_i32, %c0_i32_0 : i32, i32, i32
  }
  func.func @transform_2(%arg0: i32) -> (i32, i32, i32) {
    %c0_i32 = arith.constant 0 : i32
    %c0_i32_0 = arith.constant 0 : i32
    %c0_i32_1 = arith.constant 0 : i32
    return %arg0, %c0_i32, %c0_i32_0 : i32, i32, i32
  }
  func.func @transform_3(%arg0: i32) -> (i32, i32) {
    %c0_i32 = arith.constant 0 : i32
    %c0_i32_0 = arith.constant 0 : i32
    %c0_i32_1 = arith.constant 0 : i32
    return %c0_i32, %c0_i32_0 : i32, i32
  }
  func.func @transform_4(%arg0: i32) -> (i32, i32) {
    %c0_i32 = arith.constant 0 : i32
    %c0_i32_0 = arith.constant 0 : i32
    %c0_i32_1 = arith.constant 0 : i32
    return %c0_i32, %c0_i32_0 : i32, i32
  }
  func.func @transform_5(%arg0: i32) -> (i32, i32) {
    %c0_i32 = arith.constant 0 : i32
    %c0_i32_0 = arith.constant 0 : i32
    %c0_i32_1 = arith.constant 0 : i32
    return %c0_i32, %c0_i32_0 : i32, i32
  }
  func.func @transform_6(%arg0: i32) -> (i32, i32) {
    %c0_i32 = arith.constant 0 : i32
    %c0_i32_0 = arith.constant 0 : i32
    %c0_i32_1 = arith.constant 0 : i32
    return %c0_i32, %c0_i32_0 : i32, i32
  }
  func.func @transform_7(%arg0: i32) -> (i32, i32, i32) {
    %c0_i32 = arith.constant 0 : i32
    %c0_i32_0 = arith.constant 0 : i32
    %c0_i32_1 = arith.constant 0 : i32
    return %arg0, %c0_i32, %c0_i32_0 : i32, i32, i32
  }
}

</mosaic_0001>

<bundles_post_ra>
// kernel: tpu_custom_call.1
= control target key start
LH: loop header
LB: loop body
LE: loop exit
PB: predicated region body
PF: predicated region fallthrough
CT: control target
= control target key end

     0   :  { %12 = vsyncpa [#allocation3], 0  ;;  %s822_s0 = inlined_call_operand.hbm [shape: bf16[2,16,32], index: 0, kind: input, shape index: {}]   ;;  %s823_s1 = inlined_call_operand.vmem [shape: f32[2,16,16], index: 1, kind: input, shape index: {}]   ;;  %s824_s2 = inlined_call_operand.vmem [shape: f32[2,16,1], index: 2, kind: input, shape index: {}]   ;;  %s825_s3 = inlined_call_operand.hbm [shape: bf16[32,128], index: 3, kind: input, shape index: {}]   ;;  %s826_s4 = inlined_call_operand.vmem [shape: f32[1,128], index: 4, kind: input, shape index: {}]   ;;  %s827_s5 = inlined_call_operand.hbm [shape: bf16[128,128], index: 5, kind: input, shape index: {}]   ;;  %s828_s6 = inlined_call_operand.vmem [shape: f32[1,128], index: 6, kind: input, shape index: {}]   ;;  %s829_s7 = inlined_call_operand.hbm [shape: f32[2,16,32], index: 7, kind: output, shape index: {}]  }
   0x1   :  { %13 = vsyncpa [#allocation6], 0 }
   0x2   :  { %14 = vsyncpa [#allocation4], 0  ;;  %s36_s26 = sshll.u32 %s825_s3, 4  ;;  %s693_s27 = smov [#allocation5]   ;;  %s37_s26 = int_to_ptr.hbm [resolvable:$true] %s36_s26 }
   0x3   :  { %s38_s28 = sshll.u32 %s693_s27, 4  ;;  %s19_s8 = sshll.u32 %s822_s0, 4  ;;  %s39_s28 = int_to_ptr.vmem [resolvable:$true] %s38_s28  ;;  %s20_s8 = int_to_ptr.hbm [resolvable:$true] %s19_s8 }
   0x4   :  { %s694_s9 = smov 64   ;;  %s695_s10 = smov 4  }
   0x5   :  { %44 = dma.hbm_to_vmem [thread:$0]  %s37_s26, 256, %s39_s28, [#allocation6], %s694_s9, %s694_s9, %s695_s10  }
   0x6   :  { %s696_s11 = smov [#allocation2]   ;;  %s51_s15 = sshll.u32 %s827_s5, 4  ;;  %s52_s15 = int_to_ptr.hbm [resolvable:$true] %s51_s15 }
   0x7   :  { %s21_s12 = sshll.u32 %s696_s11, 4  ;;  %s697_s3 = smov [#allocation7]   ;;  %s22_s12 = int_to_ptr.vmem [resolvable:$true] %s21_s12 }
   0x8   :  { %27 = dma.hbm_to_vmem [thread:$0]  %s20_s8, 256, %s22_s12, [#allocation3], %s694_s9, %s694_s9, %s695_s10  }
   0x9   :  { %s53_s16 = sshll.u32 %s697_s3, 4  ;;  %s54_s16 = int_to_ptr.vmem [resolvable:$true] %s53_s16 }
   0xa   :  { %59 = dma.hbm_to_vmem [thread:$0]  %s52_s15, 1024, %s54_s16, [#allocation6], %s694_s9, %s694_s9, %s695_s10  }
   0xb   :  { %687 = dma.done.wait [#allocation3], 256  }
   0xc   :  { %688 = vsyncadd [#allocation3], 4294967040 }
   0xd   :  { %689 = dma.done.wait [#allocation6], 1280  }
   0xe   :  { %690 = vsyncadd [#allocation6], 4294966016  ;;  %v560_v0 = vld [vmem:[#allocation5 + $0x8] sm:$0xff]  ;;  %v559_v1 = vld [vmem:[#allocation5] sm:$0xff]  ;;  %vm212_vm0 = vcmask 261120   ;;  %vm113_vm1 = vcmask 130048  }
   0xf   :  { %225 = vmatpush.bf16.msra.mxu0 %v560_v0  ;;  %v557_v2 = vld [vmem:[#allocation2] sm:$0xff]  ;;  %v558_v3 = vld [vmem:[#allocation2 + $0x8] sm:$0xff]  ;;  %v81_v8 = vld [vmem:[%s823_s1 + $0x10] sm:$0xff]  ;;  %s489_s12 = sshll.u32 %s829_s7, 4  ;;  %s700_s13 = smov 128   ;;  %s490_s12 = int_to_ptr.hbm [resolvable:$true] %s489_s12 }
  0x10   :  { %v79_v4 = vld [vmem:[%s823_s1] sm:$0xff]  ;;  %v80_v6 = vld [vmem:[%s823_s1 + $0x8] sm:$0xff]  ;;  %v120_v9 = vsel %vm113_vm1, %v81_v8, 0.0  ;;  %v82_v10 = vld [vmem:[%s823_s1 + $0x18] sm:$0xff]  ;;  %v85_v25 = vpack.c.bf16 %v81_v8, %v81_v8  ;;  %s701_s14 = smov 8  }
  0x11   :  { %v114_v5 = vsel %vm113_vm1, %v79_v4, 0.0  ;;  %v117_v7 = vsel %vm113_vm1, %v80_v6, 0.0  ;;  %121 = vadd.xlane.f32.xlu1 %v120_v9  ;;  %v123_v11 = vsel %vm113_vm1, %v82_v10, 0.0  ;;  %v83_v13 = vpack.c.bf16 %v79_v4, %v79_v4  ;;  %v568_v36 = vld [vmem:[#allocation7 + $0x38] sm:$0xff]  ;;  %v567_v37 = vld [vmem:[#allocation7 + $0x30] sm:$0xff]  ;;  %v566_v38 = vld [vmem:[#allocation7 + $0x28] sm:$0xff] }
  0x12   :  { %115 = vadd.xlane.f32.xlu0 %v114_v5  ;;  %v84_v14 = vpack.c.bf16 %v80_v6, %v80_v6  ;;  %v86_v26 = vpack.c.bf16 %v82_v10, %v82_v10  ;;  %v272_v30 = vunpack.c.l.b16 %v85_v25  ;;  %377 = vmatpush.bf16.msra.mxu3 %v568_v36  ;;  %v565_v41 = vld [vmem:[#allocation7 + $0x20] sm:$0xff]  ;;  %v564_v42 = vld [vmem:[#allocation7 + $0x18] sm:$0xff]  ;;  %v563_v45 = vld [vmem:[#allocation7 + $0x10] sm:$0xff] }
  0x13   :  { %226 = vmatpush.bf16.msra.mxu0 %v559_v1  ;;  %v244_v18 = vunpack.c.l.b16 %v83_v13  ;;  %v562_v47 = vld [vmem:[#allocation7 + $0x8] sm:$0xff]  ;;  %v561_v49 = vld [vmem:[#allocation7] sm:$0xff] }
  0x14   :  { %v245_v19 = vunpack.c.l.b16 %v84_v14  ;;  %v273_v31 = vunpack.c.l.b16 %v86_v26  ;;  %v581_v6 = vld [vmem:[%s826_s4] ss:$0 sm:$0xff] }
  0x16   :  { %519 = vmatmul.msk.bf16.vlgmr.msra.gmra.mxu0 %vm212_vm0, %v557_v2  ;;  %v769_v23 = vpack.c.b16 %v245_v19, %v244_v18  ;;  %v773_v35 = vpack.c.b16 %v273_v31, %v272_v30  ;;  %378 = vmatpush.bf16.msra.mxu3 %v567_v37 }
  0x19   :  { %124 = vadd.xlane.f32.xlu1 %v123_v11 }
  0x1a   :  { %118 = vadd.xlane.f32.xlu0 %v117_v7  ;;  %379 = vmatpush.bf16.msra.mxu3 %v566_v38 }
  0x1e   :  { %380 = vmatpush.bf16.msra.mxu3 %v565_v41 }
  0x22   :  { %381 = vmatpush.bf16.msra.mxu3 %v564_v42 }
  0x26   :  { %520 = vmatmul.msk.bf16.gmra.mxu0 %vm212_vm0, %v558_v3  ;;  %382 = vmatpush.bf16.msra.mxu3 %v563_v45 }
  0x2a   :  { %383 = vmatpush.bf16.msra.mxu3 %v562_v47 }
  0x2e   :  { %384 = vmatpush.bf16.msra.mxu3 %v561_v49 }
  0x84   :  { %v122_v50 = vpop.xlane.xlu1 %121 }
  0x85   :  { %v116_v39 = vpop.xlane.xlu0 %115  ;;  %v128_v55 = vadd.f32 1.0, %v122_v50 }
  0x86   :  { %v126_v40 = vadd.f32 1.0, %v116_v39 }
  0x87   :  { %vm165_vm10 = vweird.f32 %v128_v55  ;;  %v171_v25 = vand.u32 2147483648, %v128_v55 }
  0x88   :  { %583 = vrcp.f32 %v126_v40  ;;  %vm135_vm2 = vweird.f32 %v126_v40  ;;  %v141_v56 = vand.u32 2147483648, %v126_v40  ;;  %v139_v58 = vand.u32 2147483647, %v126_v40 }
  0x8a   :  { %v142_v61 = vor.u32 1.1754944e-38, %v141_v56  ;;  %vm140_vm5 = vcmp.eq.f32.partialorder %v139_v58, 8.507059e+37 }
  0x8c   :  { %v125_v60 = vpop.xlane.xlu1 %124 }
  0x8d   :  { %v119_v43 = vpop.xlane.xlu0 %118  ;;  %v129_v0 = vadd.f32 1.0, %v125_v60  ;;  %v87_v60 = vld [vmem:[%s824_s2] sm:$0xff] }
  0x8e   :  { %v127_v44 = vadd.f32 1.0, %v119_v43  ;;  %v584_v46 = vpop.eup %583 }
  0x8f   :  { %v131_v48 = vmul.f32 %v584_v46, %v126_v40  ;;  %vm136_vm3 = vweird.f32 %v584_v46  ;;  %vm180_vm14 = vweird.f32 %v129_v0  ;;  %v186_v39 = vand.u32 2147483648, %v129_v0 }
  0x90   :  { %585 = vrcp.f32 %v127_v44  ;;  %vm137_vm4 = vmor %vm135_vm2, %vm136_vm3  ;;  %vm150_vm6 = vweird.f32 %v127_v44  ;;  %v156_v4 = vand.u32 2147483648, %v127_v44  ;;  %v154_v8 = vand.u32 2147483647, %v127_v44 }
  0x91   :  { %v132_v51 = vsub.f32 1.0, %v131_v48  ;;  %587 = vrcp.f32 %v128_v55  ;;  %v184_v42 = vand.u32 2147483647, %v129_v0  ;;  %v187_v43 = vor.u32 1.1754944e-38, %v186_v39 }
  0x92   :  { %589 = vrcp.f32 %v129_v0  ;;  %v157_v10 = vor.u32 1.1754944e-38, %v156_v4  ;;  %vm155_vm9 = vcmp.eq.f32.partialorder %v154_v8, 8.507059e+37 }
  0x93   :  { %v228_v12 = vpop.f32.mrf.mxu0  ;;  %v133_v53 = vmul.f32 %v584_v46, %v132_v51  ;;  %vm185_vm3 = vcmp.eq.f32.partialorder %v184_v42, 8.507059e+37 }
  0x94   :  { %v238_v15 = vpack.c.bf16 %v228_v12, %v228_v12 }
  0x95   :  { %v134_v57 = vadd.f32 %v584_v46, %v133_v53 }
  0x96   :  { %v249_v20 = vunpack.c.l.b16 %v238_v15  ;;  %v586_v52 = vpop.eup %585 }
  0x97   :  { %v146_v54 = vmul.f32 %v586_v52, %v127_v44  ;;  %v138_v62 = vsel %vm137_vm4, %v584_v46, %v134_v57  ;;  %vm151_vm7 = vweird.f32 %v586_v52  ;;  %v588_v1 = vpop.eup %587 }
  0x98   :  { %v777_v2 = vsel %vm140_vm5, %v142_v61, %v138_v62  ;;  %vm152_vm8 = vmor %vm150_vm6, %vm151_vm7  ;;  %v161_v9 = vmul.f32 %v588_v1, %v128_v55  ;;  %v590_v14 = vpop.eup %589  ;;  %vm166_vm11 = vweird.f32 %v588_v1  ;;  %v89_v61 = vld [vmem:[%s824_s2 + $0x10] sm:$0xff] }
  0x99   :  { %v147_v59 = vsub.f32 1.0, %v146_v54  ;;  %vm167_vm12 = vmor %vm165_vm10, %vm166_vm11  ;;  %vm181_vm15 = vweird.f32 %v590_v14 }
  0x9a   :  { %v162_v13 = vsub.f32 1.0, %v161_v9  ;;  %vm182_vm2 = vmor %vm180_vm14, %vm181_vm15 }
  0x9b   :  { %v230_v16 = vpop.f32.mrf.mxu0  ;;  %v148_v63 = vmul.f32 %v586_v52, %v147_v59 }
  0x9c   :  { %v239_v17 = vpack.c.bf16 %v230_v16, %v230_v16 }
  0x9d   :  { %v149_v7 = vadd.f32 %v586_v52, %v148_v63  ;;  %v698_v63 = vmov 0  }
  0x9e   :  { %v250_v21 = vunpack.c.l.b16 %v239_v17  ;;  %578 = vset.pattern.permute.xlu2 %v698_v63  ;;  %579 = vset.pattern.permute.xlu0 %v698_v63 }
  0x9f   :  { %v153_v12 = vsel %vm152_vm8, %v586_v52, %v149_v7  ;;  %457 = vperm.xlu2 %578, %v87_v60   ;;  %467 = vperm.xlu0 %579, %v89_v61  }
  0xa0   :  { %v251_v22 = vpack.c.b16 %v250_v21, %v249_v20  ;;  %v783_v15 = vsel %vm155_vm9, %v157_v10, %v153_v12  ;;  %v163_v20 = vmul.f32 %v588_v1, %v162_v13  ;;  %v176_v21 = vmul.f32 %v590_v14, %v129_v0  ;;  %v90_v0 = vld [vmem:[%s824_s2 + $0x18] sm:$0xff]  ;;  %580 = vset.pattern.permute.xlu1 %v698_v63  ;;  %v582_v13 = vld [vmem:[%s828_s6] ss:$0 sm:$0xff] }
  0xa1   :  { %472 = vperm.xlu1 %580, %v90_v0  }
  0xa2   :  { %263 = vmatpush.bf16.msra.mxu1 %v251_v22 }
  0xa3   :  { %v233_v24 = vpop.f32.mrf.mxu0 }
  0xa4   :  { %v240_v27 = vpack.c.bf16 %v233_v24, %v233_v24 }
  0xa5   :  { %521 = vmatmul.msk.bf16.vlgmr.msra.gmra.mxu1 %vm113_vm1, %v769_v23 }
  0xa6   :  { %v277_v32 = vunpack.c.l.b16 %v240_v27  ;;  %v164_v27 = vadd.f32 %v588_v1, %v163_v20 }
  0xab   :  { %v235_v28 = vpop.f32.mrf.mxu0 }
  0xac   :  { %v241_v29 = vpack.c.bf16 %v235_v28, %v235_v28  ;;  %v169_v28 = vand.u32 2147483647, %v128_v55 }
  0xae   :  { %v278_v33 = vunpack.c.l.b16 %v241_v29  ;;  %v177_v29 = vsub.f32 1.0, %v176_v21  ;;  %vm170_vm13 = vcmp.eq.f32.partialorder %v169_v28, 8.507059e+37 }
  0xb0   :  { %v279_v34 = vpack.c.b16 %v278_v33, %v277_v32  ;;  %v172_v32 = vor.u32 1.1754944e-38, %v171_v25  ;;  %v178_v36 = vmul.f32 %v590_v14, %v177_v29 }
  0xb2   :  { %291 = vmatpush.bf16.msra.mxu2 %v279_v34  ;;  %v168_v34 = vsel %vm167_vm12, %v588_v1, %v164_v27  ;;  %v179_v41 = vadd.f32 %v590_v14, %v178_v36 }
  0xb3   :  { %v786_v37 = vsel %vm170_vm13, %v172_v32, %v168_v34 }
  0xb4   :  { %v183_v45 = vsel %vm182_vm2, %v590_v14, %v179_v41 }
  0xb5   :  { %522 = vmatmul.msk.bf16.vlgmr.msra.gmra.mxu2 %vm113_vm1, %v773_v35  ;;  %v789_v46 = vsel %vm185_vm3, %v187_v43, %v183_v45 }
 0x122   :  { %v265_v3 = vpop.f32.mrf.mxu1 }
 0x123   :  { %v298_v5 = vmul.f32 %v265_v3, %v777_v2 }
 0x125   :  { %v305_v11 = vadd.f32 %v581_v6, %v298_v5  ;;  %v88_v5 = vld [vmem:[%s824_s2 + $0x8] sm:$0xff]  ;;  %s699_s2 = smov [#allocation8]  }
 0x126   :  { %462 = vperm.xlu2 %578, %v88_v5   ;;  %s487_s6 = sshll.u32 %s699_s2, 4  ;;  %s488_s6 = int_to_ptr.vmem [resolvable:$true] %s487_s6 }
 0x127   :  { %v309_v17 = vmax.f32 %v305_v11, 0.0 }
 0x129   :  { %v313_v22 = vpack.c.bf16 %v309_v17, %v309_v17 }
 0x12a   :  { %v267_v16 = vpop.f32.mrf.mxu1 }
 0x12b   :  { %v299_v18 = vmul.f32 %v267_v16, %v783_v15  ;;  %v321_v30 = vunpack.c.l.b16 %v313_v22 }
 0x12d   :  { %v306_v19 = vadd.f32 %v581_v6, %v299_v18 }
 0x12f   :  { %v310_v24 = vmax.f32 %v306_v19, 0.0 }
 0x131   :  { %v314_v26 = vpack.c.bf16 %v310_v24, %v310_v24 }
 0x133   :  { %v322_v31 = vunpack.c.l.b16 %v314_v26 }
 0x135   :  { %v325_v33 = vpack.c.b16 %v322_v31, %v321_v30 }
 0x137   :  { %385 = vmatmul.bf16.vlgmr.msra.gmra.mxu3 %v325_v33 }
 0x138   :  { %v293_v38 = vpop.f32.mrf.mxu2 }
 0x139   :  { %v300_v40 = vmul.f32 %v293_v38, %v786_v37 }
 0x13b   :  { %v307_v44 = vadd.f32 %v581_v6, %v300_v40 }
 0x13d   :  { %v311_v48 = vmax.f32 %v307_v44, 0.0 }
 0x13f   :  { %v315_v51 = vpack.c.bf16 %v311_v48, %v311_v48 }
 0x140   :  { %v295_v47 = vpop.f32.mrf.mxu2 }
 0x141   :  { %v301_v49 = vmul.f32 %v295_v47, %v789_v46  ;;  %v323_v54 = vunpack.c.l.b16 %v315_v51 }
 0x143   :  { %v308_v50 = vadd.f32 %v581_v6, %v301_v49 }
 0x145   :  { %v312_v52 = vmax.f32 %v308_v50, 0.0 }
 0x147   :  { %v316_v53 = vpack.c.bf16 %v312_v52, %v312_v52 }
 0x149   :  { %v324_v55 = vunpack.c.l.b16 %v316_v53 }
 0x14b   :  { %v326_v56 = vpack.c.b16 %v324_v55, %v323_v54 }
 0x14d   :  { %390 = vmatmul.bf16.gmra.mxu3 %v326_v56 }
 0x1ba   :  { %v386_v57 = vpop.f32.mrf.mxu3 }
 0x1bb   :  { %v396_v58 = vpack.c.bf16 %v386_v57, %v386_v57 }
 0x1bd   :  { %v402_v1 = vunpack.c.l.b16 %v396_v58 }
 0x1c2   :  { %v388_v59 = vpop.f32.mrf.mxu3 }
 0x1c3   :  { %v397_v62 = vpack.c.bf16 %v388_v59, %v388_v59 }
 0x1c5   :  { %v403_v3 = vunpack.c.l.b16 %v397_v62 }
 0x1c7   :  { %v404_v4 = vpack.c.b16 %v403_v3, %v402_v1 }
 0x1c9   :  { %413 = vmatpush.bf16.msrb.mxu1 %v404_v4 }
 0x1cc   :  { %555 = vmatmul.msk.bf16.vlgmr.msrb.gmra.mxu1 %vm113_vm1, %v769_v23  ;;  %v458_v23 = vpop.permute.xlu2 %457 }
 0x1d0   :  { %v391_v6 = vpop.f32.mrf.mxu3 }
 0x1d1   :  { %v398_v7 = vpack.c.bf16 %v391_v6, %v391_v6 }
 0x1d3   :  { %v422_v10 = vunpack.c.l.b16 %v398_v7 }
 0x1d4   :  { %v463_v24 = vpop.permute.xlu2 %462 }
 0x1d8   :  { %v393_v8 = vpop.f32.mrf.mxu3 }
 0x1d9   :  { %v399_v9 = vpack.c.bf16 %v393_v8, %v393_v8 }
 0x1db   :  { %v423_v11 = vunpack.c.l.b16 %v399_v9 }
 0x1dd   :  { %v424_v12 = vpack.c.b16 %v423_v11, %v422_v10 }
 0x1df   :  { %433 = vmatpush.bf16.msrb.mxu2 %v424_v12 }
 0x1e2   :  { %556 = vmatmul.msk.bf16.vlgmr.msrb.gmra.mxu2 %vm113_vm1, %v773_v35 }
 0x249   :  { %v415_v14 = vpop.f32.mrf.mxu1 }
 0x24a   :  { %v440_v16 = vmul.f32 %v415_v14, %v777_v2  ;;  %v468_v2 = vpop.permute.xlu0 %467 }
 0x24c   :  { %v447_v17 = vadd.f32 %v582_v13, %v440_v16 }
 0x24e   :  { %v451_v18 = vmax.f32 %v447_v17, 0.0 }
 0x250   :  { %v475_v19 = vmul.f32 %v458_v23, %v451_v18 }
 0x251   :  { %v417_v20 = vpop.f32.mrf.mxu1 }
 0x252   :  { %479 = vst.msk [vmem:[#allocation8] sm:$0xff] %vm212_vm0, %v475_v19  ;;  %v441_v21 = vmul.f32 %v417_v20, %v783_v15  ;;  %v473_v15 = vpop.permute.xlu1 %472 }
 0x254   :  { %v448_v22 = vadd.f32 %v582_v13, %v441_v21 }
 0x256   :  { %v452_v25 = vmax.f32 %v448_v22, 0.0 }
 0x258   :  { %v476_v35 = vmul.f32 %v463_v24, %v452_v25 }
 0x25a   :  { %480 = vst.msk [vmem:[#allocation8 + $0x8] sm:$0xff] %vm212_vm0, %v476_v35 }
 0x265   :  { %v435_v26 = vpop.f32.mrf.mxu2 }
 0x266   :  { %v442_v27 = vmul.f32 %v435_v26, %v786_v37 }
 0x268   :  { %v449_v28 = vadd.f32 %v582_v13, %v442_v27 }
 0x26a   :  { %v453_v29 = vmax.f32 %v449_v28, 0.0 }
 0x26c   :  { %v477_v30 = vmul.f32 %v468_v2, %v453_v29 }
 0x26d   :  { %v437_v31 = vpop.f32.mrf.mxu2 }
 0x26e   :  { %481 = vst.msk [vmem:[#allocation8 + $0x10] sm:$0xff] %vm212_vm0, %v477_v30  ;;  %v443_v32 = vmul.f32 %v437_v31, %v789_v46 }
 0x270   :  { %v450_v33 = vadd.f32 %v582_v13, %v443_v32 }
 0x272   :  { %v454_v34 = vmax.f32 %v450_v33, 0.0 }
 0x274   :  { %v478_v36 = vmul.f32 %v473_v15, %v454_v34 }
 0x276   :  { %482 = vst.msk [vmem:[#allocation8 + $0x18] sm:$0xff] %vm212_vm0, %v478_v36 }
 0x277   :  { %495 = dma.vmem_to_hbm [thread:$0]  %s488_s6, 512, %s490_s12, [#allocation4], %s700_s13, %s700_s13, %s701_s14  }
 0x278   :  { %691 = dma.done.wait [#allocation4], 512  }
 0x279   :  { %692 = vsyncadd [#allocation4], 4294966784 }
 0x27a   :  { %500 = vsyncpa [#allocation3], 1 }
 0x27b   :  { %501 = vsyncpa [#allocation6], 1 }
 0x27c   :  { %502 = vsyncpa [#allocation4], 1 }

</bundles_post_ra>
